<compile_context>
chip_gen: v7x
topology: tpu7x:2x2x1
jax: 0.10.0
libtpu: 0.0.40
codegen_flags: <defaults>
</compile_context>

<pallas_src>
import math
import functools

import numpy as np
import jax
import jax.numpy as jnp
from jax.experimental import pallas as pl
from jax.experimental.pallas import tpu as pltpu


_LANES = 128


def _ceil_div(a, b):
    return -(-a // b)


# ---------------------------------------------------------------------------
# Pallas kernel: one (cout_tile, batch, row_tile) step.  Builds an im2col slab
# from the main+halo input rows and does a single MXU matmul, fused bias add.
# ---------------------------------------------------------------------------
def _conv_tile_kernel(x_ref, halo_ref, w_ref, b_ref, o_ref, *,
                      K, S, TH, Wo, Cin, HALO):
    # x_ref:    (1, TH*S, Wp, Cin) bf16   main input rows of this tile
    # halo_ref: (1, HB,   Wp, Cin) bf16   rows just past the tile (first HALO used)
    # w_ref:    (K*K*Cin, TC) bf16        im2col-ordered weight slab (kh, kw, cin)
    # b_ref:    (1, TC) f32               bias
    # o_ref:    (1, TH, Wo, TC) f32       output rows of this tile
    x = x_ref[0]
    if HALO > 0:
        x = jnp.concatenate([x, halo_ref[0, :HALO]], axis=0)   # (TH*S+HALO, Wp, Cin)

    taps = []
    for kh in range(K):
        for kw in range(K):
            if S == 1:
                taps.append(x[kh:kh + TH, kw:kw + Wo, :])
            else:
                # TODO(synk): strided minor-dim slices are correct but untuned; a
                # lane-merged (W*Cin) layout + pltpu.roll extraction would be cheaper.
                taps.append(x[kh:kh + (TH - 1) * S + 1:S,
                              kw:kw + (Wo - 1) * S + 1:S, :])
    # TODO(synk): for tiny Cin, pack (kw, Cin) lane-dense in the wrapper so this concat
    # becomes cheap lane placement instead of sub-128-lane shifts.
    slab = jnp.concatenate(taps, axis=-1).reshape(TH * Wo, K * K * Cin)

    # Single MXU matmul (contraction K*K*Cin), f32 accumulation, fused bias.
    # TODO(synk): on v7x, a matmul_push_rhs/acc_lhs/pop MRB path could keep per-tap
    # accumulation inside the MXU result RAM; the single-dot path is portable.
    out = jnp.dot(slab, w_ref[...], preferred_element_type=jnp.float32) + b_ref[...]
    o_ref[0] = out.reshape(TH, Wo, -1).astype(o_ref.dtype)


# ---------------------------------------------------------------------------
# Tiling heuristics.
# ---------------------------------------------------------------------------
def _vmem_budget_and_cap():
    """(double-buffered working-set budget, vmem_limit cap) per TPU generation."""
    phys = 64 << 20
    try:
        phys = int(getattr(pltpu.get_tpu_info(), "vmem_capacity_bytes", phys))
    except Exception:
        pass
    if phys >= (96 << 20):                 # v5e / v6e: 128 MiB physical VMEM
        return 24 << 20, 48 << 20
    return 8 << 20, 40 << 20               # 64 MiB-class parts (v7x)


def _choose_row_tile(Ho, Wo, Wp, Cin, K, S, TC, budget_bytes):
    """Output-row tile TH (multiple of 8): M = TH*Wo ~ 1024 MXU rows per step while the
    double-buffered input/output blocks stay inside the per-generation VMEM budget."""
    halo = max(K - S, 0)
    th_cap = _ceil_div(max(Ho, 1), 8) * 8
    th_min = max(8, _ceil_div(_ceil_div(max(halo, 1), max(S, 1)), 8) * 8)
    th_target = max(8, _ceil_div(_ceil_div(1024, max(Wo, 1)), 8) * 8)
    th = max(min(th_cap, th_target), th_min)

    cin_pad = _ceil_div(Cin, _LANES) * _LANES       # conservative VMEM lane padding
    wp_pad = _ceil_div(Wp, 8) * 8
    kkc_pad = max(_ceil_div(K * K * Cin, _LANES) * _LANES, _LANES)

    def working_set(t):
        in_b = (t * S + 8) * wp_pad * cin_pad * 2   # bf16 input block (+ small halo)
        out_b = t * Wo * TC * 4                     # f32 output block
        slab_b = t * Wo * kkc_pad * 2               # bf16 im2col slab (compiler scratch)
        return 2 * (in_b + out_b) + slab_b

    while th - 8 >= th_min and working_set(th) > budget_bytes:
        th -= 8
    return th
    # TODO(synk): very wide images with large Cin may still exceed the budget at TH=8;
    # add column tiling if that regime ever matters for this layer.


# ---------------------------------------------------------------------------
# Conv2d wrapper (NCHW API) on top of the Pallas kernel.
# ---------------------------------------------------------------------------
def kronecker_conv2d(x_nchw, w_oihw, bias, *, stride=1, padding=0):
    """out = conv2d(x, w, bias, stride, padding) via the Pallas TPU kernel (NCHW API)."""
    N, Cin, H, W = x_nchw.shape
    Cout, Cin_w, K, K2 = w_oihw.shape
    assert Cin_w == Cin and K == K2
    P, S = int(padding), int(stride)

    # NCHW -> NHWC (bf16 for the MXU), spatial zero-pad -- layout glue outside the kernel.
    xh = jnp.transpose(x_nchw, (0, 2, 3, 1)).astype(jnp.bfloat16)
    xh = jnp.pad(xh, ((0, 0), (P, P), (P, P), (0, 0)))
    Hp, Wp = H + 2 * P, W + 2 * P
    Ho = (Hp - K) // S + 1
    Wo = (Wp - K) // S + 1

    # Output-channel tiling: lane-pad to 128 only when amplification stays <= 2x.
    if Cout >= 64:
        Cout_pad = _ceil_div(Cout, _LANES) * _LANES
        TC = 256 if Cout_pad % 256 == 0 else 128
    else:
        Cout_pad = Cout
        TC = Cout
    CT = Cout_pad // TC

    budget, cap = _vmem_budget_and_cap()
    TH = _choose_row_tile(Ho, Wo, Wp, Cin, K, S, TC, budget)
    RT = _ceil_div(Ho, TH)
    TH_i = TH * S                        # input rows owned by one tile (multiple of 8)
    HALO = max(K - S, 0)                 # extra rows needed past the tile boundary
    HB = TH_i                            # halo block rows: smallest divisor of TH_i >= HALO
    for d in range(1, TH_i + 1):
        if TH_i % d == 0 and d >= max(HALO, 1):
            HB = d
            break
    hb_per_tile = TH_i // HB             # halo block index = (t+1) * hb_per_tile

    rows_pad = max(Hp, RT * TH_i + HB)
    if rows_pad > Hp:
        xh = jnp.pad(xh, ((0, 0), (0, rows_pad - Hp), (0, 0), (0, 0)))

    # Weight (O, I, kh, kw) -> (kh, kw, I, O) -> (K*K*Cin, Cout_pad), matching the
    # im2col slab lane order (kh, kw, cin); resident in VMEM across the whole grid.
    # TODO(synk): exploit the Kronecker factorization to keep a 4x smaller weight block
    # resident (same FLOPs, less VMEM) and mix the 4 components in the epilogue.
    w2 = jnp.transpose(w_oihw.astype(jnp.float32), (2, 3, 1, 0)).reshape(K * K * Cin, Cout)
    w2 = jnp.pad(w2, ((0, 0), (0, Cout_pad - Cout))).astype(jnp.bfloat16)

    b_vec = jnp.zeros((Cout,), jnp.float32) if bias is None else bias.astype(jnp.float32)
    b2d = jnp.pad(b_vec, (0, Cout_pad - Cout)).reshape(1, Cout_pad)

    # VMEM estimate (layout-padded) -> explicit limit derived from the estimate.
    cin_pad = _ceil_div(Cin, _LANES) * _LANES
    wp_pad = _ceil_div(Wp, 8) * 8
    kkc_pad = max(_ceil_div(K * K * Cin, _LANES) * _LANES, _LANES)
    in_b = (TH_i + HB) * wp_pad * cin_pad * 2
    w_b = K * K * Cin * TC * 2
    out_b = TH * Wo * TC * 4
    slab_b = TH * Wo * kkc_pad * 2
    est = 2 * (in_b + w_b + TC * 4 + out_b) + slab_b + (2 << 20)
    vmem_limit = int(min(cap, max(2 * est, 16 << 20)))

    kernel = functools.partial(_conv_tile_kernel, K=K, S=S, TH=TH, Wo=Wo,
                               Cin=Cin, HALO=HALO)

    out_tiles = pl.pallas_call(
        kernel,
        out_shape=jax.ShapeDtypeStruct((N, RT * TH, Wo, Cout_pad), jnp.float32),
        grid_spec=pltpu.PrefetchScalarGridSpec(
            num_scalar_prefetch=0,
            grid=(CT, N, RT),
            in_specs=[
                # main rows of the tile
                pl.BlockSpec((1, TH_i, Wp, Cin), lambda c, n, t: (n, t, 0, 0)),
                # tiny halo block starting at the next tile boundary (same array)
                pl.BlockSpec((1, HB, Wp, Cin),
                             lambda c, n, t: (n, (t + 1) * hb_per_tile, 0, 0)),
                # weight / bias blocks depend only on the outer cout axis -> DMA'd CT times
                pl.BlockSpec((K * K * Cin, TC), lambda c, n, t: (0, c)),
                pl.BlockSpec((1, TC), lambda c, n, t: (0, c)),
                # TODO(synk): on v5e, pipeline_mode=pl.Buffered(3) on the x spec if xprof
                # shows exposed input DMA.
            ],
            out_specs=pl.BlockSpec((1, TH, Wo, TC), lambda c, n, t: (n, t, 0, c)),
        ),
        compiler_params=pltpu.CompilerParams(
            dimension_semantics=("parallel", "parallel", "parallel"),
            vmem_limit_bytes=vmem_limit,
        ),
    )(xh, xh, w2, b2d)

    out = out_tiles[:, :Ho, :, :Cout]
    return jnp.transpose(out, (0, 3, 1, 2))                 # back to NCHW


# ---------------------------------------------------------------------------
# KroneckerConv module (JAX side), operation='convolution2d', rotation=False.
# ---------------------------------------------------------------------------
_HAMILTON_A = np.asarray([
    [[1, 0, 0, 0], [0, 1, 0, 0], [0, 0, 1, 0], [0, 0, 0, 1]],    # r
    [[0, -1, 0, 0], [1, 0, 0, 0], [0, 0, 0, -1], [0, 0, 1, 0]],  # i
    [[0, 0, -1, 0], [0, 0, 0, 1], [1, 0, 0, 0], [0, -1, 0, 0]],  # j
    [[0, 0, 0, -1], [0, 0, -1, 0], [0, 1, 0, 0], [1, 0, 0, 0]],  # k
], dtype=np.float32)


class KroneckerConv:
    """JAX/Pallas port of KroneckerConv (2d conv path, rotation=False)."""

    def __init__(self, in_channels, out_channels, kernel_size, stride,
                 dilatation=1, padding=0, groups=1, bias=True,
                 learn_A=False, key=None):
        assert in_channels % 4 == 0 and out_channels % 4 == 0
        assert dilatation == 1 and groups == 1  # TODO(synk): dilation/groups not ported
        self.in_channels = in_channels // 4          # per quaternion component
        self.out_channels = out_channels // 4
        self.kernel_size = kernel_size
        self.stride = stride
        self.padding = padding

        if key is None:
            key = jax.random.PRNGKey(0)
        kr, ki, kj, kk = jax.random.split(key, 4)

        # TODO(synk): quaternion_init / unitary_init are not in the provided spec;
        # use a glorot-uniform init of the same shape (forward math is unchanged).
        Of, If, K = self.out_channels, self.in_channels, kernel_size
        fan_in, fan_out = If * K * K, Of * K * K
        bound = math.sqrt(6.0 / (fan_in + fan_out))
        shape = (Of, If, K, K)
        self.r_weight = jax.random.uniform(kr, shape, jnp.float32, -bound, bound)
        self.i_weight = jax.random.uniform(ki, shape, jnp.float32, -bound, bound)
        self.j_weight = jax.random.uniform(kj, shape, jnp.float32, -bound, bound)
        self.k_weight = jax.random.uniform(kk, shape, jnp.float32, -bound, bound)

        # learn_A=False: fixed Hamilton-product mixing matrices A[n] (4, 4).
        self.A = jnp.asarray(_HAMILTON_A)

        # bias is zero-initialized in reset_parameters() and applied by conv2d.
        self.bias = jnp.zeros((out_channels,), jnp.float32) if bias else None

    def weight_oihw(self):
        """sum_n kron(A[n], W_n) -> dense (out, in, K, K) conv weight."""
        F_stack = jnp.stack(
            [self.r_weight, self.i_weight, self.j_weight, self.k_weight], axis=0)
        w = jnp.einsum("nab,noikl->aobikl", self.A, F_stack)
        return w.reshape(4 * self.out_channels, 4 * self.in_channels,
                         self.kernel_size, self.kernel_size)

    def __call__(self, x_nchw):
        # rotation=True branch of the torch forward is a bare 'pass'; not ported.
        return kronecker_conv2d(x_nchw, self.weight_oihw(), self.bias,
                                stride=self.stride, padding=self.padding)


# ---------------------------------------------------------------------------
def _reference_conv(x, w, bias, stride, padding):
    """XLA conv over the SAME bf16-quantized operands, f32 accumulation."""
    ref = jax.lax.conv_general_dilated(
        x.astype(jnp.bfloat16), w.astype(jnp.bfloat16),
        window_strides=(stride, stride),
        padding=[(padding, padding), (padding, padding)],
        dimension_numbers=("NCHW", "OIHW", "NCHW"),
        preferred_element_type=jnp.float32,
    )
    if bias is not None:
        ref = ref + bias.reshape(1, -1, 1, 1)
    return ref


if __name__ == "__main__":
    key = jax.random.PRNGKey(0)
    k_in, k_par, k_in2 = jax.random.split(key, 3)

    # --- primary demo: single row tile ---------------------------------------
    batch, in_channels, out_channels = 2, 4, 8
    spatial, kernel_size, padding, stride = 16, 3, 1, 1

    x = jax.random.normal(k_in, (batch, in_channels, spatial, spatial), jnp.float32)
    layer = KroneckerConv(in_channels, out_channels, kernel_size, stride,
                          padding=padding, key=k_par)

    out = jax.block_until_ready(layer(x))
    ref = _reference_conv(x, layer.weight_oihw(), layer.bias, stride, padding)
    np.testing.assert_allclose(np.asarray(out), np.asarray(ref), rtol=2e-3, atol=2e-3)
    assert out.shape == (batch, out_channels, spatial, spatial)

    # --- secondary check: multi-row-tile path (exercises the halo blocks) ----
    spatial2 = 40
    x2 = jax.random.normal(k_in2, (1, in_channels, spatial2, spatial2), jnp.float32)
    out2 = jax.block_until_ready(layer(x2))
    ref2 = _reference_conv(x2, layer.weight_oihw(), layer.bias, stride, padding)
    np.testing.assert_allclose(np.asarray(out2), np.asarray(ref2), rtol=2e-3, atol=2e-3)
    assert out2.shape == (1, out_channels, spatial2, spatial2)

    print("KERNEL_OK")
</pallas_src>

<mosaic_0001>
module attributes {stable_mosaic.version = 11 : i64} {
  func.func @_conv_tile_kernel(%arg0: i32, %arg1: i32, %arg2: i32, %arg3: memref<1x16x18x4xbf16, #tpu.memory_space<vmem>>, %arg4: memref<1x2x18x4xbf16, #tpu.memory_space<vmem>>, %arg5: memref<36x8xbf16, #tpu.memory_space<vmem>>, %arg6: memref<1x8xf32, #tpu.memory_space<vmem>>, %arg7: memref<1x16x16x8xf32, #tpu.memory_space<vmem>>) attributes {dimension_semantics = [#tpu.dimension_semantics<parallel>, #tpu.dimension_semantics<parallel>, #tpu.dimension_semantics<parallel>], iteration_bounds = array<i64: 1, 2, 1>, scalar_prefetch = 0 : i64, scratch_operands = 0 : i64, tpu.core_type = #tpu.core_type<tc>, window_params = [{transform_indices = @transform_0, window_bounds = array<i64: 1, 16, 18, 4>}, {transform_indices = @transform_1, window_bounds = array<i64: 1, 2, 18, 4>}, {transform_indices = @transform_2, window_bounds = array<i64: 36, 8>}, {transform_indices = @transform_3, window_bounds = array<i64: 1, 8>}, {transform_indices = @transform_4, window_bounds = array<i64: 1, 16, 16, 8>}]} {
    %c0 = arith.constant 0 : index
    %c0_0 = arith.constant 0 : index
    %c0_1 = arith.constant 0 : index
    %c0_2 = arith.constant 0 : index
    %0 = vector.load %arg3[%c0, %c0_0, %c0_1, %c0_2] : memref<1x16x18x4xbf16, #tpu.memory_space<vmem>>, vector<1x16x18x4xbf16>
    %1 = vector.shape_cast %0 : vector<1x16x18x4xbf16> to vector<16x18x4xbf16>
    %c0_3 = arith.constant 0 : index
    %c0_4 = arith.constant 0 : index
    %c0_5 = arith.constant 0 : index
    %c0_6 = arith.constant 0 : index
    %2 = vector.load %arg4[%c0_3, %c0_4, %c0_5, %c0_6] : memref<1x2x18x4xbf16, #tpu.memory_space<vmem>>, vector<1x2x18x4xbf16>
    %3 = vector.shape_cast %2 : vector<1x2x18x4xbf16> to vector<2x18x4xbf16>
    %4 = tpu.concatenate %1, %3 in 0 : vector<16x18x4xbf16>, vector<2x18x4xbf16> -> vector<18x18x4xbf16>
    %5 = vector.extract_strided_slice %4 {offsets = [0, 0, 0], sizes = [16, 16, 4], strides = [1, 1, 1]} : vector<18x18x4xbf16> to vector<16x16x4xbf16>
    %6 = vector.extract_strided_slice %4 {offsets = [0, 1, 0], sizes = [16, 16, 4], strides = [1, 1, 1]} : vector<18x18x4xbf16> to vector<16x16x4xbf16>
    %7 = vector.extract_strided_slice %4 {offsets = [0, 2, 0], sizes = [16, 16, 4], strides = [1, 1, 1]} : vector<18x18x4xbf16> to vector<16x16x4xbf16>
    %8 = vector.extract_strided_slice %4 {offsets = [1, 0, 0], sizes = [16, 16, 4], strides = [1, 1, 1]} : vector<18x18x4xbf16> to vector<16x16x4xbf16>
    %9 = vector.extract_strided_slice %4 {offsets = [1, 1, 0], sizes = [16, 16, 4], strides = [1, 1, 1]} : vector<18x18x4xbf16> to vector<16x16x4xbf16>
    %10 = vector.extract_strided_slice %4 {offsets = [1, 2, 0], sizes = [16, 16, 4], strides = [1, 1, 1]} : vector<18x18x4xbf16> to vector<16x16x4xbf16>
    %11 = vector.extract_strided_slice %4 {offsets = [2, 0, 0], sizes = [16, 16, 4], strides = [1, 1, 1]} : vector<18x18x4xbf16> to vector<16x16x4xbf16>
    %12 = vector.extract_strided_slice %4 {offsets = [2, 1, 0], sizes = [16, 16, 4], strides = [1, 1, 1]} : vector<18x18x4xbf16> to vector<16x16x4xbf16>
    %13 = vector.extract_strided_slice %4 {offsets = [2, 2, 0], sizes = [16, 16, 4], strides = [1, 1, 1]} : vector<18x18x4xbf16> to vector<16x16x4xbf16>
    %14 = tpu.concatenate %5, %6, %7, %8, %9, %10, %11, %12, %13 in 2 : vector<16x16x4xbf16>, vector<16x16x4xbf16>, vector<16x16x4xbf16>, vector<16x16x4xbf16>, vector<16x16x4xbf16>, vector<16x16x4xbf16>, vector<16x16x4xbf16>, vector<16x16x4xbf16>, vector<16x16x4xbf16> -> vector<16x16x36xbf16>
    %15 = vector.shape_cast %14 : vector<16x16x36xbf16> to vector<256x36xbf16>
    %c0_7 = arith.constant 0 : index
    %c0_8 = arith.constant 0 : index
    %16 = vector.load %arg5[%c0_7, %c0_8] : memref<36x8xbf16, #tpu.memory_space<vmem>>, vector<36x8xbf16>
    %cst = arith.constant dense<0.000000e+00> : vector<256x8xf32>
    %17 = tpu.matmul %15, %16, %cst {dimension_numbers = #tpu.dot_dimension_numbers<[1], [0], [0], [1], [0, 0, 1, 1], [], []>} : vector<256x36xbf16>, vector<36x8xbf16>, vector<256x8xf32> -> vector<256x8xf32>
    %c0_9 = arith.constant 0 : index
    %c0_10 = arith.constant 0 : index
    %18 = vector.load %arg6[%c0_9, %c0_10] : memref<1x8xf32, #tpu.memory_space<vmem>>, vector<1x8xf32>
    %19 = vector.broadcast %18 : vector<1x8xf32> to vector<256x8xf32>
    %20 = arith.addf %17, %19 : vector<256x8xf32>
    %21 = vector.shape_cast %20 : vector<256x8xf32> to vector<16x16x8xf32>
    %c0_11 = arith.constant 0 : index
    %c0_12 = arith.constant 0 : index
    %c0_13 = arith.constant 0 : index
    %c0_14 = arith.constant 0 : index
    %22 = vector.load %arg7[%c0_11, %c0_12, %c0_13, %c0_14] : memref<1x16x16x8xf32, #tpu.memory_space<vmem>>, vector<1x16x16x8xf32>
    %23 = vector.shape_cast %22 : vector<1x16x16x8xf32> to vector<16x16x8xf32>
    %24 = vector.shape_cast %21 : vector<16x16x8xf32> to vector<1x16x16x8xf32>
    tpu.vector_store %arg7[%c0_11, %c0_12, %c0_13, %c0_14], %24 {strides = array<i32>} : memref<1x16x16x8xf32, #tpu.memory_space<vmem>>, vector<1x16x16x8xf32>,
    return
  }
  func.func @transform_0(%arg0: i32, %arg1: i32, %arg2: i32) -> (i32, i32, i32, i32) {
    %c0_i32 = arith.constant 0 : i32
    %c0_i32_0 = arith.constant 0 : i32
    %c0_i32_1 = arith.constant 0 : i32
    return %arg1, %arg2, %c0_i32, %c0_i32_0 : i32, i32, i32, i32
  }
  func.func @transform_1(%arg0: i32, %arg1: i32, %arg2: i32) -> (i32, i32, i32, i32) {
    %c1_i32 = arith.constant 1 : i32
    %0 = arith.addi %arg2, %c1_i32 : i32
    %c8_i32 = arith.constant 8 : i32
    %1 = arith.muli %0, %c8_i32 : i32
    %c0_i32 = arith.constant 0 : i32
    %c0_i32_0 = arith.constant 0 : i32
    %c0_i32_1 = arith.constant 0 : i32
    return %arg1, %1, %c0_i32, %c0_i32_0 : i32, i32, i32, i32
  }
  func.func @transform_2(%arg0: i32, %arg1: i32, %arg2: i32) -> (i32, i32) {
    %c0_i32 = arith.constant 0 : i32
    %c0_i32_0 = arith.constant 0 : i32
    return %c0_i32, %arg0 : i32, i32
  }
  func.func @transform_3(%arg0: i32, %arg1: i32, %arg2: i32) -> (i32, i32) {
    %c0_i32 = arith.constant 0 : i32
    %c0_i32_0 = arith.constant 0 : i32
    return %c0_i32, %arg0 : i32, i32
  }
  func.func @transform_4(%arg0: i32, %arg1: i32, %arg2: i32) -> (i32, i32, i32, i32) {
    %c0_i32 = arith.constant 0 : i32
    %c0_i32_0 = arith.constant 0 : i32
    return %arg1, %arg2, %c0_i32, %arg0 : i32, i32, i32, i32
  }
}

</mosaic_0001>

<bundles_post_ra>
// kernel: tpu_custom_call.1
= control target key start
LH: loop header
LB: loop body
LE: loop exit
PB: predicated region body
PF: predicated region fallthrough
CT: control target
= control target key end

     0   :  { %s2041_s15 = smov 0   ;;  %s2043_s16 = smov 0   ;;  %s2860_s0 = inlined_call_operand.vmem [shape: bf16[2,18,18,4], index: 0, kind: input, shape index: {}]   ;;  %s2861_s1 = inlined_call_operand.vmem [shape: bf16[2,18,18,4], index: 1, kind: input, shape index: {}]   ;;  %s2862_s2 = inlined_call_operand.vmem [shape: bf16[36,8], index: 2, kind: input, shape index: {}]   ;;  %s2863_s3 = inlined_call_operand.vmem [shape: f32[1,8], index: 3, kind: input, shape index: {}]   ;;  %s2864_s4 = inlined_call_operand.vmem [shape: f32[2,16,16,8], index: 4, kind: output, shape index: {}]  }
   0x1   :  { %s2045_s17 = smov 0  }
   0x2 LB: > { %s29_s18 = sadd.s32 1, %s2002_s16  ;;  %p1777_p0 = scmp.ge.s32.totalorder %s2006_s17, 1  ;;  %s2006_s17 = sphi %s2045_s17, %s14_s17   ;;  %s2002_s16 = sphi %s2043_s16, %s2866_s16   ;;  %s1998_s15 = sphi %s2041_s15, %s2865_s15  }
   0x3   : > { %p31_p1 = scmp.ge.s32.totalorder %s29_s18, 2  ;;  %p246_p2 = scmp.lt.s32.totalorder %s2006_s17, 3 }
   0x5   : > { %s2868_s18 = smov (%p31_p1, %s29_s18), 0  ;;  %p247_p3 = pnand %p1777_p0, %p246_p2 }
   0x6   : > { %p315_p4 = scmp.lt.s32.totalorder (!%p247_p3), %s1998_s15, 1  ;;  %vm774_vm0 = vcmask (!%p247_p3), 1046528   ;;  %s2008_s23 = smov (!%p247_p3), 12   ;;  %vm549_vm1 = vsmask.f32 (!%p247_p3), 7424  ;;  %vm1417_vm2 = vcmask (!%p247_p3), 1041408  }
   0x7   : > { %250 = sbr.rel (%p247_p3) target bundleno = 606 (0x25e), region = 36  ;;  %s2009_s24 = smov (!%p247_p3), 8   ;;  %vm1093_vm3 = vcmask (!%p247_p3), 31744   ;;  %vm1126_vm4 = vcmask (!%p247_p3), 64512   ;;  %vm1192_vm5 = vcmask (!%p247_p3), 130048   ;;  %vm1159_vm6 = vcmask (!%p247_p3), 97280  }
   0x8   : > { %s2010_s25 = smov (!%p247_p3), 4   ;;  %s2011_s26 = smov (!%p247_p3), 16   ;;  %vm1225_vm7 = vcmask (!%p247_p3), 162816   ;;  %vm1258_vm8 = vcmask (!%p247_p3), 195584   ;;  %vm1291_vm9 = vcmask (!%p247_p3), 228352   ;;  %vm1324_vm10 = vcmask (!%p247_p3), 261120  }
   0x9   : > { %s2012_s27 = smov (!%p247_p3), 20   ;;  %s2013_s28 = smov (!%p247_p3), 24   ;;  %vm1384_vm11 = vcmask (!%p247_p3), 293888  }
   0xa   : > { %s2014_s7 = smov (!%p247_p3), 28   ;;  %s2015_s10 = smov (!%p247_p3), 32  }
   0xe   : > { %s2870_s15 = smov (!%p315_p4, %s1998_s15), 1 }
   0xf   : > { %s1908_s19 = smul.u32 216, %s2870_s15 }
  0x11   : > { %s2067_s22 = scalar_lea.vmem %s2860_s0, %s1908_s19  ;;  %s1841_s11 = sadd.s32 192, %s1908_s19 }
  0x12   : > { %v2070_v0 = vld [vmem:[%s2067_s22 + $0x6c] sm:$0xff]   ;;  %v2080_v2 = vld [vmem:[%s2067_s22 + $0x60] sm:$0xff]   ;;  %v1946_v3 = vld [vmem:[%s2067_s22 + $0x68] ss:$0 sps:$4 sm:$0x11]   ;;  %s2253_s14 = scalar_lea.vmem %s2861_s1, %s1841_s11  ;;  %s1842_s19 = sshll.u32 %s2870_s15, 8 }
  0x13   : > { %v2073_v1 = vld [vmem:[%s2067_s22 + $0xc] sm:$0xff]   ;;  %876 = vrot.lane.b32.xlu1 %v2070_v0, %s2008_s23  ;;  %v2084_v4 = vld [vmem:[%s2067_s22] sm:$0xff]   ;;  %v802_v5 = vrot.slane %v2070_v0, 1  ;;  %v799_v6 = vrot.slane %v2080_v2, 1  ;;  %v800_v7 = vrot.slane %v1946_v3, 1  ;;  %v659_v26 = vshrl.u32 %v2070_v0, 16 }
  0x14   : > { %860 = vrot.lane.b32.xlu0 %v2073_v1, %s2008_s23  ;;  %v1948_v8 = vld [vmem:[%s2067_s22 + $0x8] ss:$0 sps:$4 sm:$0x11]   ;;  %v778_v9 = vrot.slane %v2073_v1, 1  ;;  %v775_v10 = vrot.slane %v2084_v4, 1  ;;  %v563_v16 = vshrl.u32 %v2073_v1, 16 }
  0x15   : > { %v1949_v11 = vld [vmem:[%s2067_s22 + $0x74] ss:$0 sps:$4 sm:$0x11]   ;;  %v2093_v12 = vsel %vm774_vm0, %v799_v6, %v800_v7  ;;  %v776_v13 = vrot.slane %v1948_v8, 1  ;;  %v565_v17 = vshll.u32 %v2073_v1, 16  ;;  %v551_v18 = vshrl.u32 %v2084_v4, 16 }
  0x16   : > { %v1950_v14 = vld [vmem:[%s2067_s22 + $0x14] ss:$0 sps:$4 sm:$0x11]   ;;  %v803_v15 = vrot.slane %v1949_v11, 1  ;;  %v553_v22 = vshll.u32 %v2084_v4, 16  ;;  %v558_v25 = vshll.u32 %v1948_v8, 16 }
  0x17   : > { %839 = vrot.lane.b32.xlu1 %v2093_v12, %s2009_s24  ;;  %v777_v19 = vsel %vm774_vm0, %v775_v10, %v776_v13  ;;  %v779_v20 = vrot.slane %v1950_v14, 1  ;;  %v570_v21 = vshll.u32 %v1950_v14, 16  ;;  %v567_v24 = vrot.slane %v565_v17, 1  ;;  %v2115_v39 = vld [vmem:[%s2067_s22 + $0x78] sm:$0xff]   ;;  %v2173_v14 = vld [vmem:[%s2067_s22 + $0x24] sm:$0xff]  }
  0x18   : > { %823 = vrot.lane.b32.xlu0 %v777_v19, %s2009_s24  ;;  %v2105_v23 = vsel %vm774_vm0, %v802_v5, %v803_v15  ;;  %v555_v29 = vrot.slane %v553_v22, 1  ;;  %v661_v30 = vshll.u32 %v2070_v0, 16  ;;  %v560_v32 = vrot.slane %v558_v25, 1  ;;  %v2121_v46 = vld [vmem:[%s2067_s22 + $0x18] sm:$0xff]   ;;  %v1971_v19 = vld [vmem:[%s2862_s2] sm:$0xff]  }
  0x19   : > { %v780_v27 = vsel %vm774_vm0, %v778_v9, %v779_v20  ;;  %v572_v28 = vrot.slane %v570_v21, 1  ;;  %v568_v31 = vor.u32 %v567_v24, %v563_v16  ;;  %v666_v33 = vshll.u32 %v1949_v11, 16  ;;  %v1953_v47 = vld [vmem:[%s2067_s22 + $0x80] ss:$0 sps:$4 sm:$0x11]   ;;  %v2166_v11 = vld [vmem:[%s2067_s22 + $0x84] sm:$0xff]   ;;  %1862 = vmatprep.subr.bf16.mxu0 %v1971_v19  ;;  %1900 = vmatprep.subr.bf16.mxu1 %v1971_v19 }
  0x1a   : > { %v647_v34 = vshrl.u32 %v2080_v2, 16  ;;  %v556_v35 = vor.u32 %v555_v29, %v551_v18  ;;  %v663_v36 = vrot.slane %v661_v30, 1  ;;  %v649_v37 = vshll.u32 %v2080_v2, 16  ;;  %v1954_v52 = vld [vmem:[%s2067_s22 + $0x20] ss:$0 sps:$4 sm:$0x11]   ;;  %1863 = vmatpush3.bf16.msra.mxu0 %v1971_v19  ;;  %1903 = vmatpush3.bf16.msra.mxu1 %v1971_v19 }
  0x1b   : > { %841 = vrot.lane.b32.xlu1 %v2105_v23, %s2009_s24  ;;  %v654_v38 = vshll.u32 %v1946_v3, 16  ;;  %v573_v40 = vsel %vm549_vm1, %v568_v31, %v572_v28  ;;  %v668_v41 = vrot.slane %v666_v33, 1  ;;  %v673_v50 = vshll.u32 %v2115_v39, 16  ;;  %v1957_v15 = vld [vmem:[%s2067_s22 + $0x8c] ss:$0 sps:$4 sm:$0x11]  }
  0x1c   : > { %825 = vrot.lane.b32.xlu0 %v780_v27, %s2009_s24  ;;  %v561_v42 = vsel %vm549_vm1, %v556_v35, %v560_v32  ;;  %v664_v43 = vor.u32 %v663_v36, %v659_v26  ;;  %v651_v44 = vrot.slane %v649_v37, 1  ;;  %v577_v53 = vshll.u32 %v2121_v46, 16  ;;  %v1958_v17 = vld [vmem:[%s2067_s22 + $0x2c] ss:$0 sps:$4 sm:$0x11]  }
  0x1d   : > { %v656_v45 = vrot.slane %v654_v38, 1  ;;  %v671_v54 = vshrl.u32 %v2115_v39, 16  ;;  %v675_v55 = vrot.slane %v673_v50, 1  ;;  %v678_v56 = vshll.u32 %v1953_v47, 16 }
  0x1e   : > { %v2126_v48 = vsel %vm549_vm1, %v664_v43, %v668_v41  ;;  %v652_v49 = vor.u32 %v651_v44, %v647_v34  ;;  %v575_v57 = vshrl.u32 %v2121_v46, 16  ;;  %v579_v58 = vrot.slane %v577_v53, 1  ;;  %v1975_v32 = vld [vmem:[%s2862_s2 + $0x10] ss:$0 sps:$4 sm:$0x33]  }
  0x1f   : > { %744 = vrot.lane.b32.xlu1 %v573_v40, %s2010_s25  ;;  %v582_v59 = vshll.u32 %v1954_v52, 16  ;;  %v676_v60 = vor.u32 %v675_v55, %v671_v54  ;;  %v680_v61 = vrot.slane %v678_v56, 1  ;;  %v805_v6 = vrot.slane %v2115_v39, 1  ;;  %v2229_v43 = vld [vmem:[%s2067_s22 + $0x90] sm:$0xff]  }
  0x20   : > { %742 = vrot.lane.b32.xlu0 %v561_v42, %s2010_s25  ;;  %v2131_v51 = vsel %vm549_vm1, %v652_v49, %v656_v45  ;;  %v580_v62 = vor.u32 %v579_v58, %v575_v57  ;;  %v806_v7 = vrot.slane %v1953_v47, 1  ;;  %v781_v8 = vrot.slane %v2121_v46, 1  ;;  %v2234_v44 = vld [vmem:[%s2067_s22 + $0x30] sm:$0xff]   ;;  %v1961_v45 = vld [vmem:[%s2067_s22 + $0x98] ss:$0 sps:$4 sm:$0x11]  }
  0x21   : > { %v584_v63 = vrot.slane %v582_v59, 1  ;;  %v2148_v3 = vsel %vm549_vm1, %v676_v60, %v680_v61  ;;  %v782_v9 = vrot.slane %v1954_v52, 1  ;;  %v685_v16 = vshll.u32 %v2166_v11, 16  ;;  %v1962_v49 = vld [vmem:[%s2067_s22 + $0x38] ss:$0 sps:$4 sm:$0x11]  }
  0x22   : > { %v2163_v10 = vsel %vm774_vm0, %v805_v6, %v806_v7  ;;  %v589_v18 = vshll.u32 %v2173_v14, 16  ;;  %v683_v20 = vshrl.u32 %v2166_v11, 16  ;;  %v690_v22 = vshll.u32 %v1957_v15, 16 }
  0x23   : > { %760 = vrot.lane.b32.xlu1 %v2126_v48, %s2010_s25  ;;  %v2152_v5 = vsel %vm549_vm1, %v580_v62, %v584_v63  ;;  %v2170_v13 = vsel %vm774_vm0, %v781_v8, %v782_v9  ;;  %v687_v21 = vrot.slane %v685_v16, 1  ;;  %v587_v24 = vshrl.u32 %v2173_v14, 16  ;;  %v2270_v9 = vld [vmem:[%s2067_s22 + $0x9c] sm:$0xff]  }
  0x24   : > { %758 = vrot.lane.b32.xlu0 %v2131_v51, %s2010_s25  ;;  %v591_v25 = vrot.slane %v589_v18, 1  ;;  %v594_v26 = vshll.u32 %v1958_v17, 16  ;;  %v692_v29 = vrot.slane %v690_v22, 1  ;;  %v1419_v34 = vsel %vm1417_vm2, %v1975_v32, 0 }
  0x25   : > { %v688_v28 = vor.u32 %v687_v21, %v683_v20  ;;  %v808_v36 = vrot.slane %v2166_v11, 1  ;;  %v809_v37 = vrot.slane %v1957_v15, 1  ;;  %v784_v38 = vrot.slane %v2173_v14, 1  ;;  %v1965_v15 = vld [vmem:[%s2067_s22 + $0xa4] ss:$0 sps:$4 sm:$0x11]  }
  0x26   : > { %v592_v30 = vor.u32 %v591_v25, %v587_v24  ;;  %v596_v31 = vrot.slane %v594_v26, 1  ;;  %v697_v47 = vshll.u32 %v2229_v43, 16  ;;  %v601_v50 = vshll.u32 %v2234_v44, 16 }
  0x27   : > { %878 = vrot.lane.b32.xlu1 %v2115_v39, %s2008_s23  ;;  %v693_v33 = vsel %vm549_vm1, %v688_v28, %v692_v29  ;;  %v810_v41 = vsel %vm774_vm0, %v808_v36, %v809_v37  ;;  %v702_v52 = vshll.u32 %v1961_v45, 16  ;;  %v695_v53 = vshrl.u32 %v2229_v43, 16 }
  0x28   : > { %862 = vrot.lane.b32.xlu0 %v2121_v46, %s2008_s23  ;;  %v597_v35 = vsel %vm549_vm1, %v592_v30, %v596_v31  ;;  %v699_v54 = vrot.slane %v697_v47, 1  ;;  %v599_v55 = vshrl.u32 %v2234_v44, 16  ;;  %v603_v56 = vrot.slane %v601_v50, 1 }
  0x29   : > { %v606_v57 = vshll.u32 %v1962_v49, 16  ;;  %v704_v58 = vrot.slane %v702_v52, 1  ;;  %v787_v6 = vrot.slane %v2234_v44, 1  ;;  %v788_v7 = vrot.slane %v1962_v49, 1 }
  0x2a   : > { %v700_v59 = vor.u32 %v699_v54, %v695_v53  ;;  %v604_v60 = vor.u32 %v603_v56, %v599_v55  ;;  %v709_v16 = vshll.u32 %v2270_v9, 16  ;;  %v707_v19 = vshrl.u32 %v2270_v9, 16  ;;  %v2336_v56 = vld [vmem:[%s2067_s22 + $0xa8] sm:$0xff]  }
  0x2b   : > { %923 = vrot.lane.b32.xlu1 %v2126_v48, %s2011_s26  ;;  %v608_v61 = vrot.slane %v606_v57, 1  ;;  %v714_v21 = vshll.u32 %v1965_v15, 16  ;;  %v814_v36 = vrot.slane %v2270_v9, 1  ;;  %v815_v37 = vrot.slane %v1965_v15, 1 }
  0x2c   : > { %907 = vrot.lane.b32.xlu0 %v573_v40, %s2011_s26  ;;  %v785_v40 = vrot.slane %v1958_v17, 1  ;;  %v705_v62 = vsel %vm549_vm1, %v700_v59, %v704_v58  ;;  %v1966_v17 = vld [vmem:[%s2067_s22 + $0x44] ss:$0 sps:$4 sm:$0x11]   ;;  %v711_v20 = vrot.slane %v709_v16, 1  ;;  %v2342_v58 = vld [vmem:[%s2067_s22 + $0x48] sm:$0xff]  }
  0x2d   : > { %v609_v63 = vsel %vm549_vm1, %v604_v60, %v608_v61  ;;  %v618_v25 = vshll.u32 %v1966_v17, 16  ;;  %v1969_v60 = vld [vmem:[%s2067_s22 + $0xb0] ss:$0 sps:$4 sm:$0x11]   ;;  %v721_v61 = vshll.u32 %v2336_v56, 16  ;;  %v623_v15 = vshrl.u32 %v2342_v58, 16 }
  0x2e   : > { %v786_v42 = vsel %vm774_vm0, %v784_v38, %v785_v40  ;;  %v712_v26 = vor.u32 %v711_v20, %v707_v19 }
  0x2f   : > { %925 = vrot.lane.b32.xlu1 %v2148_v3, %s2011_s26  ;;  %v620_v29 = vrot.slane %v618_v25, 1 }
  0x30   : > { %909 = vrot.lane.b32.xlu0 %v2152_v5, %s2011_s26 }
  0x33   : > { %958 = vrot.lane.b32.xlu1 %v2105_v23, %s2012_s27 }
  0x34   : > { %942 = vrot.lane.b32.xlu0 %v780_v27, %s2012_s27  ;;  %v1972_v27 = vld [vmem:[%s2862_s2 + $0x8] sm:$0xff]  }
  0x35   : > { %1864 = vmatprep.subr.bf16.mxu0 %v1972_v27  ;;  %1901 = vmatprep.subr.bf16.mxu1 %v1972_v27 }
  0x36   : > { %1865 = vmatpush3.bf16.msra.mxu0 %v1972_v27  ;;  %1904 = vmatpush3.bf16.msra.mxu1 %v1972_v27  ;;  %v716_v27 = vrot.slane %v714_v21, 1 }
  0x37   : > { %960 = vrot.lane.b32.xlu1 %v2163_v10, %s2012_s27  ;;  %1906 = vmatprep.subr.msk.bf16.mxu0 %vm1417_vm2, %v1975_v32 }
  0x38   : > { %944 = vrot.lane.b32.xlu0 %v2170_v13, %s2012_s27  ;;  %1907 = vmatprep.subr.msk.bf16.mxu1 %vm1417_vm2, %v1975_v32  ;;  %v717_v31 = vsel %vm549_vm1, %v712_v26, %v716_v27 }
  0x3a   : > { %1867 = vmatpush3.bf16.msra.mxu0 %v1419_v34  ;;  %1905 = vmatpush3.bf16.msra.mxu1 %v1419_v34 }
  0x3b   : > { %995 = vrot.lane.b32.xlu1 %v2115_v39, %s2013_s28 }
  0x3c   : > { %979 = vrot.lane.b32.xlu0 %v2121_v46, %s2013_s28 }
  0x3f   : > { %997 = vrot.lane.b32.xlu1 %v2166_v11, %s2013_s28 }
  0x40   : > { %981 = vrot.lane.b32.xlu0 %v2173_v14, %s2013_s28 }
  0x43   : > { %1042 = vrot.lane.b32.xlu1 %v2148_v3, %s2014_s7 }
  0x44   : > { %1026 = vrot.lane.b32.xlu0 %v2152_v5, %s2014_s7 }
  0x47   : > { %1044 = vrot.lane.b32.xlu1 %v693_v33, %s2014_s7 }
  0x48   : > { %1028 = vrot.lane.b32.xlu0 %v597_v35, %s2014_s7 }
  0x4b   : > { %1077 = vrot.lane.b32.xlu1 %v2163_v10, %s2015_s10 }
  0x4c   : > { %1061 = vrot.lane.b32.xlu0 %v2170_v13, %s2015_s10 }
  0x4f   : > { %762 = vrot.lane.b32.xlu1 %v2148_v3, %s2010_s25  ;;  %v811_v3 = vrot.slane %v2229_v43, 1 }
  0x50   : > { %746 = vrot.lane.b32.xlu0 %v2152_v5, %s2010_s25  ;;  %v812_v5 = vrot.slane %v1961_v45, 1  ;;  %v816_v45 = vsel %vm774_vm0, %v814_v36, %v815_v37  ;;  %v817_v36 = vrot.slane %v2336_v56, 1  ;;  %v818_v37 = vrot.slane %v1969_v60, 1 }
  0x52   : > { %v813_v8 = vsel %vm774_vm0, %v811_v3, %v812_v5  ;;  %v625_v3 = vshll.u32 %v2342_v58, 16 }
  0x53   : > { %1079 = vrot.lane.b32.xlu1 %v810_v41, %s2015_s10 }
  0x54   : > { %1063 = vrot.lane.b32.xlu0 %v786_v42, %s2015_s10  ;;  %v627_v16 = vrot.slane %v625_v3, 1  ;;  %v2398_v3 = vld [vmem:[%s2067_s22 + $0xb4] sm:$0xff]  }
  0x57   : > { %764 = vrot.lane.b32.xlu1 %v693_v33, %s2010_s25 }
  0x58   : > { %748 = vrot.lane.b32.xlu0 %v597_v35, %s2010_s25 }
  0x5b   : > { %843 = vrot.lane.b32.xlu1 %v2163_v10, %s2009_s24  ;;  %v789_v10 = vsel %vm774_vm0, %v787_v6, %v788_v7  ;;  %v719_v6 = vshrl.u32 %v2336_v56, 16  ;;  %v723_v7 = vrot.slane %v721_v61, 1 }
  0x5c   : > { %827 = vrot.lane.b32.xlu0 %v2170_v13, %s2009_s24  ;;  %v2275_v13 = vld [vmem:[%s2067_s22 + $0x3c] sm:$0xff]  }
  0x5d   : > { %v613_v18 = vshll.u32 %v2275_v13, 16  ;;  %v611_v22 = vshrl.u32 %v2275_v13, 16  ;;  %v790_v40 = vrot.slane %v2275_v13, 1  ;;  %v724_v19 = vor.u32 %v723_v7, %v719_v6 }
  0x5f   : > { %845 = vrot.lane.b32.xlu1 %v810_v41, %s2009_s24  ;;  %v615_v24 = vrot.slane %v613_v18, 1 }
  0x60   : > { %829 = vrot.lane.b32.xlu0 %v786_v42, %s2009_s24 }
  0x61   : > { %v616_v28 = vor.u32 %v615_v24, %v611_v22  ;;  %v628_v22 = vor.u32 %v627_v16, %v623_v15 }
  0x63   : > { %880 = vrot.lane.b32.xlu1 %v2166_v11, %s2008_s23 }
  0x64   : > { %864 = vrot.lane.b32.xlu0 %v2173_v14, %s2008_s23 }
  0x67   : > { %882 = vrot.lane.b32.xlu1 %v2229_v43, %s2008_s23 }
  0x68   : > { %866 = vrot.lane.b32.xlu0 %v2234_v44, %s2008_s23 }
  0x6b   : > { %927 = vrot.lane.b32.xlu1 %v693_v33, %s2011_s26  ;;  %v621_v33 = vsel %vm549_vm1, %v616_v28, %v620_v29 }
  0x6c   : > { %911 = vrot.lane.b32.xlu0 %v597_v35, %s2011_s26 }
  0x6f   : > { %929 = vrot.lane.b32.xlu1 %v705_v62, %s2011_s26 }
  0x70   : > { %913 = vrot.lane.b32.xlu0 %v609_v63, %s2011_s26 }
  0x73   : > { %962 = vrot.lane.b32.xlu1 %v810_v41, %s2012_s27  ;;  %v791_v41 = vrot.slane %v1966_v17, 1 }
  0x74   : > { %946 = vrot.lane.b32.xlu0 %v786_v42, %s2012_s27 }
  0x75   : > { %v2321_v49 = vsel %vm774_vm0, %v790_v40, %v791_v41 }
  0x77   : > { %964 = vrot.lane.b32.xlu1 %v813_v8, %s2012_s27 }
  0x78   : > { %948 = vrot.lane.b32.xlu0 %v789_v10, %s2012_s27 }
  0x7b   : > { %999 = vrot.lane.b32.xlu1 %v2229_v43, %s2013_s28 }
  0x7c   : > { %983 = vrot.lane.b32.xlu0 %v2234_v44, %s2013_s28 }
  0x7f   : > { %1001 = vrot.lane.b32.xlu1 %v2270_v9, %s2013_s28 }
  0x80   : > { %985 = vrot.lane.b32.xlu0 %v2275_v13, %s2013_s28 }
  0x83   : > { %1046 = vrot.lane.b32.xlu1 %v705_v62, %s2014_s7 }
  0x84   : > { %1030 = vrot.lane.b32.xlu0 %v609_v63, %s2014_s7 }
  0x85   : > { %v2294_v30 = vpop.permute.xlu1 %876 }
  0x86   : > { %v2298_v32 = vpop.permute.xlu0 %860 }
  0x87   : > { %1048 = vrot.lane.b32.xlu1 %v717_v31, %s2014_s7 }
  0x88   : > { %1032 = vrot.lane.b32.xlu0 %v621_v33, %s2014_s7 }
  0x89   : > { %v2303_v34 = vpop.permute.xlu1 %839 }
  0x8a   : > { %v2305_v35 = vpop.permute.xlu0 %823 }
  0x8b   : > { %1081 = vrot.lane.b32.xlu1 %v813_v8, %s2015_s10 }
  0x8c   : > { %1065 = vrot.lane.b32.xlu0 %v789_v10, %s2015_s10 }
  0x8d   : > { %v2310_v38 = vpop.permute.xlu1 %841 }
  0x8e   : > { %v2313_v42 = vpop.permute.xlu0 %825 }
  0x8f   : > { %766 = vrot.lane.b32.xlu1 %v705_v62, %s2010_s25 }
  0x90   : > { %750 = vrot.lane.b32.xlu0 %v609_v63, %s2010_s25  ;;  %v1970_v63 = vld [vmem:[%s2067_s22 + $0x50] ss:$0 sps:$4 sm:$0x11]  }
  0x91   : > { %v2318_v47 = vpop.permute.xlu1 %744  ;;  %v630_v17 = vshll.u32 %v1970_v63, 16  ;;  %v794_v40 = vrot.slane %v1970_v63, 1 }
  0x92   : > { %v743_v50 = vpop.permute.xlu0 %742 }
  0x93   : > { %1083 = vrot.lane.b32.xlu1 %v816_v45, %s2015_s10  ;;  %v632_v24 = vrot.slane %v630_v17, 1  ;;  %v1095_v6 = vsel %vm1093_vm3, %v2084_v4, %v743_v50 }
  0x94   : > { %1067 = vrot.lane.b32.xlu0 %v2321_v49, %s2015_s10  ;;  %v1128_v4 = vsel %vm1126_vm4, %v1095_v6, %v2305_v35  ;;  %v2427_v35 = vld [vmem:[%s2067_s22 + $0x5c] ss:$0 sps:$4 sm:$0x11]  }
  0x95   : > { %v2326_v52 = vpop.permute.xlu1 %760  ;;  %v2379_v28 = vsel %vm549_vm1, %v628_v22, %v632_v24  ;;  %v731_v22 = vshrl.u32 %v2398_v3, 16 }
  0x96   : > { %v759_v53 = vpop.permute.xlu0 %758 }
  0x97   : > { %768 = vrot.lane.b32.xlu1 %v717_v31, %s2010_s25  ;;  %v1111_v41 = vsel %vm1093_vm3, %v2080_v2, %v759_v53 }
  0x98   : > { %752 = vrot.lane.b32.xlu0 %v621_v33, %s2010_s25  ;;  %v1144_v53 = vsel %vm1126_vm4, %v1111_v41, %v2303_v34  ;;  %v733_v34 = vshll.u32 %v2398_v3, 16 }
  0x99   : > { %v2330_v54 = vpop.permute.xlu1 %878  ;;  %v1177_v50 = vsel %vm1159_vm6, %v1144_v53, %v2294_v30  ;;  %v642_v53 = vshll.u32 %v2427_v35, 16 }
  0x9a   : > { %v2332_v55 = vpop.permute.xlu0 %862 }
  0x9b   : > { %847 = vrot.lane.b32.xlu1 %v813_v8, %s2009_s24  ;;  %v726_v8 = vshll.u32 %v1969_v60, 16  ;;  %v2395_v60 = vsel %vm774_vm0, %v817_v36, %v818_v37  ;;  %v735_v36 = vrot.slane %v733_v34, 1 }
  0x9c   : > { %831 = vrot.lane.b32.xlu0 %v789_v10, %s2009_s24 }
  0x9d   : > { %v2339_v57 = vpop.permute.xlu1 %923  ;;  %v728_v20 = vrot.slane %v726_v8, 1 }
  0x9e   : > { %v2344_v59 = vpop.permute.xlu0 %907  ;;  %v1210_v16 = vsel %vm1192_vm5, %v1177_v50, %v2339_v57 }
  0x9f   : > { %849 = vrot.lane.b32.xlu1 %v816_v45, %s2009_s24  ;;  %v2375_v26 = vsel %vm549_vm1, %v724_v19, %v728_v20  ;;  %v1161_v19 = vsel %vm1159_vm6, %v1128_v4, %v2298_v32  ;;  %v1113_v32 = vsel %vm1093_vm3, %v2070_v0, %v2326_v52  ;;  %v1097_v0 = vsel %vm1093_vm3, %v2073_v1, %v2318_v47 }
  0xa0   : > { %833 = vrot.lane.b32.xlu0 %v2321_v49, %s2009_s24  ;;  %v1194_v57 = vsel %vm1192_vm5, %v1161_v19, %v2344_v59  ;;  %v736_v4 = vor.u32 %v735_v36, %v731_v22  ;;  %v1130_v47 = vsel %vm1126_vm4, %v1097_v0, %v2313_v42 }
  0xa1   : > { %v2351_v62 = vpop.permute.xlu1 %925 }
  0xa2   : > { %v2355_v5 = vpop.permute.xlu0 %909 }
  0xa3   : > { %884 = vrot.lane.b32.xlu1 %v2270_v9, %s2008_s23 }
  0xa4   : > { %868 = vrot.lane.b32.xlu0 %v2275_v13, %s2008_s23 }
  0xa5   : > { %v959_v10 = vpop.permute.xlu1 %958 }
  0xa6   : > { %v2363_v18 = vpop.permute.xlu0 %942  ;;  %v1243_v20 = vsel %vm1225_vm7, %v1210_v16, %v959_v10  ;;  %v644_v16 = vrot.slane %v642_v53, 1  ;;  %v1978_v53 = vld [vmem:[%s2253_s14] sm:$0xff]  }
  0xa7   : > { %886 = vrot.lane.b32.xlu1 %v2336_v56, %s2008_s23  ;;  %v1227_v10 = vsel %vm1225_vm7, %v1194_v57, %v2363_v18 }
  0xa8   : > { %870 = vrot.lane.b32.xlu0 %v2342_v58, %s2008_s23 }
  0xa9   : > { %v2369_v21 = vpop.permute.xlu1 %960 }
  0xaa   : > { %v2371_v25 = vpop.permute.xlu0 %944 }
  0xab   : > { %931 = vrot.lane.b32.xlu1 %v717_v31, %s2011_s26 }
  0xac   : > { %915 = vrot.lane.b32.xlu0 %v621_v33, %s2011_s26  ;;  %v793_v33 = vrot.slane %v2342_v58, 1 }
  0xad   : > { %v996_v27 = vpop.permute.xlu1 %995 }
  0xae   : > { %v980_v29 = vpop.permute.xlu0 %979  ;;  %v2407_v7 = vsel %vm774_vm0, %v793_v33, %v794_v40  ;;  %v1276_v24 = vsel %vm1258_vm8, %v1243_v20, %v996_v27 }
  0xaf   : > { %933 = vrot.lane.b32.xlu1 %v2375_v26, %s2011_s26  ;;  %v1260_v27 = vsel %vm1258_vm8, %v1227_v10, %v980_v29  ;;  %v1146_v29 = vsel %vm1126_vm4, %v1113_v32, %v2310_v38 }
  0xb0   : > { %917 = vrot.lane.b32.xlu0 %v2379_v28, %s2011_s26  ;;  %v1179_v50 = vsel %vm1159_vm6, %v1146_v29, %v2330_v54  ;;  %v898_v29 = vshll.u32 %v1978_v53, 16 }
  0xb1   : > { %v2386_v31 = vpop.permute.xlu1 %997  ;;  %v1212_v38 = vsel %vm1192_vm5, %v1179_v50, %v2351_v62 }
  0xb2   : > { %v2391_v61 = vpop.permute.xlu0 %981  ;;  %v1245_v54 = vsel %vm1225_vm7, %v1212_v38, %v2369_v21 }
  0xb3   : > { %966 = vrot.lane.b32.xlu1 %v816_v45, %s2012_s27  ;;  %v2410_v45 = vld [vmem:[%s2067_s22 + $0x54] sm:$0xff]   ;;  %v1278_v42 = vsel %vm1258_vm8, %v1245_v54, %v2386_v31 }
  0xb4   : > { %950 = vrot.lane.b32.xlu0 %v2321_v49, %s2012_s27  ;;  %v2417_v49 = vld [vmem:[%s2067_s22 + $0xbc] ss:$0 sps:$4 sm:$0x11]   ;;  %v637_v17 = vshll.u32 %v2410_v45, 16  ;;  %v635_v59 = vshrl.u32 %v2410_v45, 16  ;;  %v796_v10 = vrot.slane %v2410_v45, 1 }
  0xb5   : > { %v1043_v63 = vpop.permute.xlu1 %1042  ;;  %v738_v37 = vshll.u32 %v2417_v49, 16 }
  0xb6   : > { %v1027_v8 = vpop.permute.xlu0 %1026  ;;  %v1309_v33 = vsel %vm1291_vm9, %v1276_v24, %v1043_v63  ;;  %v639_v6 = vrot.slane %v637_v17, 1  ;;  %v1163_v17 = vsel %vm1159_vm6, %v1130_v47, %v2332_v55 }
  0xb7   : > { %968 = vrot.lane.b32.xlu1 %v2395_v60, %s2012_s27  ;;  %v1293_v52 = vsel %vm1291_vm9, %v1260_v27, %v1027_v8  ;;  %v740_v34 = vrot.slane %v738_v37, 1  ;;  %v1196_v20 = vsel %vm1192_vm5, %v1163_v17, %v2355_v5  ;;  %v821_v37 = vrot.slane %v2417_v49, 1 }
  0xb8   : > { %952 = vrot.lane.b32.xlu0 %v2407_v7, %s2012_s27  ;;  %v640_v8 = vor.u32 %v639_v6, %v635_v59  ;;  %v1229_v22 = vsel %vm1225_vm7, %v1196_v20, %v2371_v25 }
  0xb9   : > { %v1045_v15 = vpop.permute.xlu1 %1044  ;;  %v741_v62 = vsel %vm549_vm1, %v736_v4, %v740_v34  ;;  %v1262_v57 = vsel %vm1258_vm8, %v1229_v22, %v2391_v61  ;;  %v900_v34 = vrot.slane %v898_v29, 1  ;;  %v939_v22 = vrot.slane %v1978_v53, 1 }
  0xba   : > { %v1029_v30 = vpop.permute.xlu0 %1028  ;;  %v1311_v55 = vsel %vm1291_vm9, %v1278_v42, %v1045_v15  ;;  %v645_v5 = vsel %vm549_vm1, %v640_v8, %v644_v16 }
  0xbb   : > { %1003 = vrot.lane.b32.xlu1 %v2336_v56, %s2013_s28  ;;  %v1295_v31 = vsel %vm1291_vm9, %v1262_v57, %v1029_v30  ;;  %v820_v30 = vrot.slane %v2398_v3, 1  ;;  %v2572_v57 = vld [vmem:[%s2253_s14 + $0xc] sm:$0xff]  }
  0xbc   : > { %987 = vrot.lane.b32.xlu0 %v2342_v58, %s2013_s28 }
  0xbd   : > { %v1078_v40 = vpop.permute.xlu1 %1077  ;;  %v822_v59 = vsel %vm774_vm0, %v820_v30, %v821_v37  ;;  %v1017_v30 = vshll.u32 %v2572_v57, 16 }
  0xbe   : > { %v1342_v41 = vsel %vm1324_vm10, %v1309_v33, %v1078_v40  ;;  %v1062_v18 = vpop.permute.xlu0 %1061  ;;  %v797_v33 = vrot.slane %v2427_v35, 1 }
  0xbf   : > { %1005 = vrot.lane.b32.xlu1 %v2398_v3, %s2013_s28  ;;  %1884 = vmatprep.mubr.msk.bf16.mxu1 %vm1384_vm11, %v1342_v41  ;;  %v1326_v63 = vsel %vm1324_vm10, %v1293_v52, %v1062_v18  ;;  %v1979_v18 = vld [vmem:[%s2253_s14 + $0x8] ss:$0 sps:$4 sm:$0x11]  }
  0xc0   : > { %989 = vrot.lane.b32.xlu0 %v2410_v45, %s2013_s28  ;;  %1868 = vmatprep.mubr.msk.bf16.mxu0 %vm1384_vm11, %v1326_v63  ;;  %v798_v27 = vsel %vm774_vm0, %v796_v10, %v797_v33  ;;  %v903_v50 = vshll.u32 %v1979_v18, 16 }
  0xc1   : > { %v2467_v1 = vpop.permute.xlu1 %762 }
  0xc2   : > { %v2477_v19 = vpop.permute.xlu0 %746  ;;  %v905_v8 = vrot.slane %v903_v50, 1 }
  0xc3   : > { %1050 = vrot.lane.b32.xlu1 %v2375_v26, %s2014_s7  ;;  %v1099_v37 = vsel %vm1093_vm3, %v2121_v46, %v2477_v19  ;;  %v1015_v46 = vshrl.u32 %v2572_v57, 16 }
  0xc4   : > { %1034 = vrot.lane.b32.xlu0 %v2379_v28, %s2014_s7 }
  0xc5   : > { %v1080_v21 = vpop.permute.xlu1 %1079 }
  0xc6   : > { %v1344_v24 = vsel %vm1324_vm10, %v1311_v55, %v1080_v21  ;;  %v1064_v36 = vpop.permute.xlu0 %1063 }
  0xc7   : > { %1052 = vrot.lane.b32.xlu1 %v741_v62, %s2014_s7  ;;  %1885 = vmatmul.mubr.msk.bf16.vlgmr.msra.gmra.mrb[0].mxu1 %vm1384_vm11, %v1344_v24  ;;  %v1328_v25 = vsel %vm1324_vm10, %v1295_v31, %v1064_v36 }
  0xc8   : > { %1036 = vrot.lane.b32.xlu0 %v645_v5, %s2014_s7  ;;  %1869 = vmatmul.mubr.msk.bf16.vlgmr.msra.gmra.mrb[0].mxu0 %vm1384_vm11, %v1328_v25  ;;  %v2582_v25 = vld [vmem:[%s2253_s14 + $0x14] ss:$0 sps:$4 sm:$0x11]  }
  0xc9   : > { %v2501_v15 = vpop.permute.xlu1 %764  ;;  %v1022_v29 = vshll.u32 %v2582_v25, 16 }
  0xca   : > { %v2503_v61 = vpop.permute.xlu0 %748 }
  0xcb   : > { %1085 = vrot.lane.b32.xlu1 %v2395_v60, %s2015_s10 }
  0xcc   : > { %1069 = vrot.lane.b32.xlu0 %v2407_v7, %s2015_s10 }
  0xcd   : > { %v844_v32 = vpop.permute.xlu1 %843 }
  0xce   : > { %v2513_v40 = vpop.permute.xlu0 %827 }
  0xcf   : > { %770 = vrot.lane.b32.xlu1 %v2375_v26, %s2010_s25 }
  0xd0   : > { %754 = vrot.lane.b32.xlu0 %v2379_v28, %s2010_s25 }
  0xd1   : > { %v2520_v49 = vpop.permute.xlu1 %845 }
  0xd2   : > { %v2523_v41 = vpop.permute.xlu0 %829 }
  0xd3   : > { %1087 = vrot.lane.b32.xlu1 %v822_v59, %s2015_s10 }
  0xd4   : > { %1071 = vrot.lane.b32.xlu0 %v798_v27, %s2015_s10 }
  0xd5   : > { %v881_v35 = vpop.permute.xlu1 %880 }
  0xd6   : > { %v865_v6 = vpop.permute.xlu0 %864 }
  0xd7   : > { %772 = vrot.lane.b32.xlu1 %v741_v62, %s2010_s25 }
  0xd8   : > { %756 = vrot.lane.b32.xlu0 %v645_v5, %s2010_s25 }
  0xd9   : > { %v2529_v26 = vpop.permute.xlu1 %882 }
  0xda   : > { %v2531_v28 = vpop.permute.xlu0 %866 }
  0xdb   : > { %851 = vrot.lane.b32.xlu1 %v2395_v60, %s2009_s24  ;;  %v896_v60 = vshrl.u32 %v1978_v53, 16 }
  0xdc   : > { %835 = vrot.lane.b32.xlu0 %v2407_v7, %s2009_s24 }
  0xdd   : > { %v928_v0 = vpop.permute.xlu1 %927  ;;  %v901_v38 = vor.u32 %v900_v34, %v896_v60  ;;  %v1982_v60 = vld [vmem:[%s2067_s22 + $0x60] sm:$0xff]  }
  0xde   : > { %v912_v52 = vpop.permute.xlu0 %911 }
  0xdf   : > { %853 = vrot.lane.b32.xlu1 %v822_v59, %s2009_s24  ;;  %v2558_v54 = vsel %vm549_vm1, %v901_v38, %v905_v8 }
  0xe0   : > { %837 = vrot.lane.b32.xlu0 %v798_v27, %s2009_s24  ;;  %s2753_s24 = scalar_lea.vmem %s2864_s4, %s1842_s19 }
  0xe1   : > { %v2541_v63 = vpop.permute.xlu1 %929 }
  0xe2   : > { %v2543_v4 = vpop.permute.xlu0 %913 }
  0xe3   : > { %888 = vrot.lane.b32.xlu1 %v2398_v3, %s2008_s23 }
  0xe4   : > { %872 = vrot.lane.b32.xlu0 %v2410_v45, %s2008_s23 }
  0xe5   : > { %v963_v7 = vpop.permute.xlu1 %962 }
  0xe6   : > { %v947_v47 = vpop.permute.xlu0 %946 }
  0xe7   : > { %890 = vrot.lane.b32.xlu1 %v1978_v53, %s2008_s23 }
  0xe8   : > { %874 = vrot.lane.b32.xlu0 %v2080_v2, %s2008_s23  ;;  %v940_v2 = vrot.slane %v1979_v18, 1  ;;  %v1019_v18 = vrot.slane %v1017_v30, 1  ;;  %v1059_v30 = vrot.slane %v2582_v25, 1 }
  0xe9   : > { %v2552_v16 = vpop.permute.xlu1 %964 }
  0xea   : > { %v2554_v17 = vpop.permute.xlu0 %948  ;;  %v1020_v8 = vor.u32 %v1019_v18, %v1015_v46 }
  0xeb   : > { %935 = vrot.lane.b32.xlu1 %v741_v62, %s2011_s26  ;;  %v2569_v62 = vsel %vm774_vm0, %v939_v22, %v940_v2 }
  0xec   : > { %919 = vrot.lane.b32.xlu0 %v645_v5, %s2011_s26  ;;  %v1115_v5 = vsel %vm1093_vm3, %v2115_v39, %v2467_v1  ;;  %v1132_v1 = vsel %vm1126_vm4, %v1099_v37, %v2513_v40 }
  0xed   : > { %v1000_v20 = vpop.permute.xlu1 %999  ;;  %v1148_v36 = vsel %vm1126_vm4, %v1115_v5, %v844_v32  ;;  %v1165_v33 = vsel %vm1159_vm6, %v1132_v1, %v865_v6 }
  0xee   : > { %v984_v42 = vpop.permute.xlu0 %983  ;;  %v1181_v10 = vsel %vm1159_vm6, %v1148_v36, %v881_v35  ;;  %v1198_v19 = vsel %vm1192_vm5, %v1165_v33, %v912_v52  ;;  %v1117_v52 = vsel %vm1093_vm3, %v2166_v11, %v2501_v15  ;;  %v1983_v15 = vld [vmem:[%s2067_s22 + $0x6c] sm:$0xff]  }
  0xef   : > { %937 = vrot.lane.b32.xlu1 %v2558_v54, %s2011_s26  ;;  %v1214_v32 = vsel %vm1192_vm5, %v1181_v10, %v928_v0  ;;  %v1231_v40 = vsel %vm1225_vm7, %v1198_v19, %v947_v47  ;;  %v1150_v47 = vsel %vm1126_vm4, %v1117_v52, %v2520_v49 }
  0xf0   : > { %921 = vrot.lane.b32.xlu0 %v2131_v51, %s2011_s26  ;;  %v1183_v11 = vsel %vm1159_vm6, %v1150_v47, %v2529_v26 }
  0xf1   : > { %v1002_v55 = vpop.permute.xlu1 %1001  ;;  %v1216_v2 = vsel %vm1192_vm5, %v1183_v11, %v2541_v63 }
  0xf2   : > { %v2565_v21 = vpop.permute.xlu0 %985 }
  0xf3   : > { %970 = vrot.lane.b32.xlu1 %v822_v59, %s2012_s27  ;;  %v1247_v59 = vsel %vm1225_vm7, %v1214_v32, %v963_v7 }
  0xf4   : > { %954 = vrot.lane.b32.xlu0 %v798_v27, %s2012_s27  ;;  %v1280_v35 = vsel %vm1258_vm8, %v1247_v59, %v1000_v20  ;;  %v1024_v20 = vrot.slane %v1022_v29, 1 }
  0xf5   : > { %v1047_v24 = vpop.permute.xlu1 %1046 }
  0xf6   : > { %v1031_v31 = vpop.permute.xlu0 %1030  ;;  %v1313_v0 = vsel %vm1291_vm9, %v1280_v35, %v1047_v24 }
  0xf7   : > { %972 = vrot.lane.b32.xlu1 %v2569_v62, %s2012_s27 }
  0xf8   : > { %956 = vrot.lane.b32.xlu0 %v2093_v12, %s2012_s27 }
  0xf9   : > { %v1049_v39 = vpop.permute.xlu1 %1048 }
  0xfa   : > { %v1033_v27 = vpop.permute.xlu0 %1032 }
  0xfb   : > { %1007 = vrot.lane.b32.xlu1 %v1978_v53, %s2013_s28  ;;  %v1264_v53 = vsel %vm1258_vm8, %v1231_v40, %v984_v42  ;;  %v1101_v42 = vsel %vm1093_vm3, %v2173_v14, %v2503_v61  ;;  %v1249_v14 = vsel %vm1225_vm7, %v1216_v2, %v2552_v16 }
  0xfc   : > { %991 = vrot.lane.b32.xlu0 %v1982_v60, %s2013_s28  ;;  %v1297_v50 = vsel %vm1291_vm9, %v1264_v53, %v1031_v31  ;;  %v1134_v49 = vsel %vm1126_vm4, %v1101_v42, %v2523_v41  ;;  %v1282_v5 = vsel %vm1258_vm8, %v1249_v14, %v1002_v55  ;;  %v1025_v41 = vsel %vm549_vm1, %v1020_v8, %v1024_v20 }
  0xfd   : > { %v1082_v6 = vpop.permute.xlu1 %1081  ;;  %v1167_v24 = vsel %vm1159_vm6, %v1134_v49, %v2531_v28  ;;  %v1315_v31 = vsel %vm1291_vm9, %v1282_v5, %v1049_v39  ;;  %v1058_v55 = vrot.slane %v2572_v57, 1 }
  0xfe   : > { %v1346_v34 = vsel %vm1324_vm10, %v1313_v0, %v1082_v6  ;;  %v1066_v7 = vpop.permute.xlu0 %1065  ;;  %v1200_v26 = vsel %vm1192_vm5, %v1167_v24, %v2543_v4 }
  0xff   : > { %1009 = vrot.lane.b32.xlu1 %v2572_v57, %s2013_s28  ;;  %1888 = vmatprep.mubr.msk.bf16.mxu1 %vm1384_vm11, %v1346_v34  ;;  %v1330_v38 = vsel %vm1324_vm10, %v1297_v50, %v1066_v7  ;;  %v1233_v63 = vsel %vm1225_vm7, %v1200_v26, %v2554_v17  ;;  %v1060_v37 = vsel %vm774_vm0, %v1058_v55, %v1059_v30 }
 0x100   : > { %993 = vrot.lane.b32.xlu0 %v1983_v15, %s2013_s28  ;;  %1872 = vmatprep.mubr.msk.bf16.mxu0 %vm1384_vm11, %v1330_v38  ;;  %v1266_v16 = vsel %vm1258_vm8, %v1233_v63, %v2565_v21 }
 0x101   : > { %v767_v22 = vpop.permute.xlu1 %766  ;;  %v1299_v4 = vsel %vm1291_vm9, %v1266_v16, %v1033_v27 }
 0x102   : > { %v751_v61 = vpop.permute.xlu0 %750 }
 0x103   : > { %1054 = vrot.lane.b32.xlu1 %v2558_v54, %s2014_s7  ;;  %v1103_v52 = vsel %vm1093_vm3, %v2234_v44, %v751_v61 }
 0x104   : > { %1038 = vrot.lane.b32.xlu0 %v2131_v51, %s2014_s7 }
 0x105   : > { %v1084_v28 = vpop.permute.xlu1 %1083 }
 0x106   : > { %v1348_v54 = vsel %vm1324_vm10, %v1315_v31, %v1084_v28  ;;  %v1068_v36 = vpop.permute.xlu0 %1067 }
 0x107   : > { %1056 = vrot.lane.b32.xlu1 %v1025_v41, %s2014_s7  ;;  %1889 = vmatmul.mubr.msk.bf16.gmra.mrb[4].mxu1 %vm1384_vm11, %v1348_v54  ;;  %v1332_v17 = vsel %vm1324_vm10, %v1299_v4, %v1068_v36 }
 0x108   : > { %1040 = vrot.lane.b32.xlu0 %v2126_v48, %s2014_s7  ;;  %1873 = vmatmul.mubr.msk.bf16.gmra.mrb[4].mxu0 %vm1384_vm11, %v1332_v17 }
 0x109   : > { %v769_v51 = vpop.permute.xlu1 %768 }
 0x10a   : > { %v753_v21 = vpop.permute.xlu0 %752  ;;  %v1121_v24 = vsel %vm1093_vm3, %v2270_v9, %v769_v51 }
 0x10b   : > { %1089 = vrot.lane.b32.xlu1 %v2569_v62, %s2015_s10  ;;  %v1105_v41 = vsel %vm1093_vm3, %v2275_v13, %v753_v21 }
 0x10c   : > { %1073 = vrot.lane.b32.xlu0 %v2093_v12, %s2015_s10 }
 0x10d   : > { %v848_v10 = vpop.permute.xlu1 %847 }
 0x10e   : > { %v832_v39 = vpop.permute.xlu0 %831 }
 0x10f   : > { %1091 = vrot.lane.b32.xlu1 %v1060_v37, %s2015_s10  ;;  %v1136_v47 = vsel %vm1126_vm4, %v1103_v52, %v832_v39 }
 0x110   : > { %1075 = vrot.lane.b32.xlu0 %v2105_v23, %s2015_s10  ;;  %v1119_v23 = vsel %vm1093_vm3, %v2229_v43, %v767_v22 }
 0x111   : > { %v850_v48 = vpop.permute.xlu1 %849  ;;  %v1152_v34 = vsel %vm1126_vm4, %v1119_v23, %v848_v10 }
 0x112   : > { %v834_v57 = vpop.permute.xlu0 %833  ;;  %v1154_v26 = vsel %vm1126_vm4, %v1121_v24, %v850_v48 }
 0x113   : > { %v1138_v28 = vsel %vm1126_vm4, %v1105_v41, %v834_v57 }
 0x115   : > { %v885_v25 = vpop.permute.xlu1 %884 }
 0x116   : > { %v869_v1 = vpop.permute.xlu0 %868  ;;  %v1185_v50 = vsel %vm1159_vm6, %v1152_v34, %v885_v25 }
 0x117   : > { %v1169_v8 = vsel %vm1159_vm6, %v1136_v47, %v869_v1 }
 0x119   : > { %v887_v32 = vpop.permute.xlu1 %886 }
 0x11a   : > { %v871_v33 = vpop.permute.xlu0 %870  ;;  %v1187_v63 = vsel %vm1159_vm6, %v1154_v26, %v887_v32 }
 0x11b   : > { %v1171_v16 = vsel %vm1159_vm6, %v1138_v28, %v871_v33 }
 0x11d   : > { %v932_v59 = vpop.permute.xlu1 %931 }
 0x11e   : > { %v916_v62 = vpop.permute.xlu0 %915  ;;  %v1218_v38 = vsel %vm1192_vm5, %v1185_v50, %v932_v59 }
 0x11f   : > { %v1202_v43 = vsel %vm1192_vm5, %v1169_v8, %v916_v62 }
 0x121   : > { %v934_v27 = vpop.permute.xlu1 %933 }
 0x122   : > { %v918_v46 = vpop.permute.xlu0 %917  ;;  %v1220_v9 = vsel %vm1192_vm5, %v1187_v63, %v934_v27 }
 0x123   : > { %v1204_v36 = vsel %vm1192_vm5, %v1171_v16, %v918_v46 }
 0x125   : > { %v967_v19 = vpop.permute.xlu1 %966 }
 0x126   : > { %v951_v35 = vpop.permute.xlu0 %950  ;;  %v1251_v20 = vsel %vm1225_vm7, %v1218_v38, %v967_v19 }
 0x127   : > { %v1235_v15 = vsel %vm1225_vm7, %v1202_v43, %v951_v35 }
 0x129   : > { %v969_v12 = vpop.permute.xlu1 %968 }
 0x12a   : > { %v953_v18 = vpop.permute.xlu0 %952  ;;  %v1253_v54 = vsel %vm1225_vm7, %v1220_v9, %v969_v12 }
 0x12b   : > { %v1237_v13 = vsel %vm1225_vm7, %v1204_v36, %v953_v18 }
 0x12d   : > { %v1004_v29 = vpop.permute.xlu1 %1003 }
 0x12e   : > { %v988_v40 = vpop.permute.xlu0 %987  ;;  %v1284_v11 = vsel %vm1258_vm8, %v1251_v20, %v1004_v29 }
 0x12f   : > { %v1268_v49 = vsel %vm1258_vm8, %v1235_v15, %v988_v40 }
 0x131   : > { %v1006_v0 = vpop.permute.xlu1 %1005 }
 0x132   : > { %v990_v60 = vpop.permute.xlu0 %989  ;;  %v1286_v17 = vsel %vm1258_vm8, %v1253_v54, %v1006_v0 }
 0x133   : > { %v1270_v51 = vsel %vm1258_vm8, %v1237_v13, %v990_v60 }
 0x135   : > { %v1051_v6 = vpop.permute.xlu1 %1050 }
 0x136   : > { %v1035_v53 = vpop.permute.xlu0 %1034  ;;  %v1317_v44 = vsel %vm1291_vm9, %v1284_v11, %v1051_v6 }
 0x137   : > { %v1301_v14 = vsel %vm1291_vm9, %v1268_v49, %v1035_v53 }
 0x139   : > { %v1053_v7 = vpop.permute.xlu1 %1052 }
 0x13a   : > { %v1037_v42 = vpop.permute.xlu0 %1036  ;;  %v1319_v55 = vsel %vm1291_vm9, %v1286_v17, %v1053_v7 }
 0x13b   : > { %v1303_v37 = vsel %vm1291_vm9, %v1270_v51, %v1037_v42 }
 0x13d   : > { %v1086_v22 = vpop.permute.xlu1 %1085 }
 0x13e   : > { %v1350_v2 = vsel %vm1324_vm10, %v1317_v44, %v1086_v22  ;;  %v1070_v61 = vpop.permute.xlu0 %1069 }
 0x13f   : > { %1892 = vmatprep.mubr.msk.bf16.mxu1 %vm1384_vm11, %v1350_v2  ;;  %v1334_v5 = vsel %vm1324_vm10, %v1301_v14, %v1070_v61 }
 0x140   : > { %1876 = vmatprep.mubr.msk.bf16.mxu0 %vm1384_vm11, %v1334_v5 }
 0x141   : > { %v771_v31 = vpop.permute.xlu1 %770 }
 0x142   : > { %v755_v4 = vpop.permute.xlu0 %754  ;;  %v1123_v50 = vsel %vm1093_vm3, %v2336_v56, %v771_v31 }
 0x143   : > { %v1107_v38 = vsel %vm1093_vm3, %v2342_v58, %v755_v4 }
 0x145   : > { %v1088_v30 = vpop.permute.xlu1 %1087 }
 0x146   : > { %v1352_v21 = vsel %vm1324_vm10, %v1319_v55, %v1088_v30  ;;  %v1072_v10 = vpop.permute.xlu0 %1071 }
 0x147   : > { %1893 = vmatmul.mubr.msk.bf16.gmra.mrb[8].mxu1 %vm1384_vm11, %v1352_v21  ;;  %v1336_v39 = vsel %vm1324_vm10, %v1303_v37, %v1072_v10  ;;  %v2748_v10 = vld [vmem:[%s2863_s3] ss:$0 sm:$0xff] }
 0x148   : > { %1877 = vmatmul.mubr.msk.bf16.gmra.mrb[8].mxu0 %vm1384_vm11, %v1336_v39 }
 0x149   : > { %v773_v48 = vpop.permute.xlu1 %772 }
 0x14a   : > { %v757_v57 = vpop.permute.xlu0 %756  ;;  %v1125_v11 = vsel %vm1093_vm3, %v2398_v3, %v773_v48 }
 0x14b   : > { %v1109_v2 = vsel %vm1093_vm3, %v2410_v45, %v757_v57 }
 0x14d   : > { %v852_v25 = vpop.permute.xlu1 %851 }
 0x14e   : > { %v836_v1 = vpop.permute.xlu0 %835  ;;  %v1156_v47 = vsel %vm1126_vm4, %v1123_v50, %v852_v25 }
 0x14f   : > { %v1140_v42 = vsel %vm1126_vm4, %v1107_v38, %v836_v1 }
 0x151   : > { %v854_v32 = vpop.permute.xlu1 %853 }
 0x152   : > { %v838_v33 = vpop.permute.xlu0 %837  ;;  %v1158_v22 = vsel %vm1126_vm4, %v1125_v11, %v854_v32 }
 0x153   : > { %v1142_v26 = vsel %vm1126_vm4, %v1109_v2, %v838_v33 }
 0x155   : > { %v889_v59 = vpop.permute.xlu1 %888 }
 0x156   : > { %v873_v62 = vpop.permute.xlu0 %872  ;;  %v1189_v8 = vsel %vm1159_vm6, %v1156_v47, %v889_v59 }
 0x157   : > { %v1173_v15 = vsel %vm1159_vm6, %v1140_v42, %v873_v62 }
 0x159   : > { %v891_v27 = vpop.permute.xlu1 %890 }
 0x15a   : > { %v875_v46 = vpop.permute.xlu0 %874  ;;  %v1191_v24 = vsel %vm1159_vm6, %v1158_v22, %v891_v27 }
 0x15b   : > { %v1175_v31 = vsel %vm1159_vm6, %v1142_v26, %v875_v46 }
 0x15d   : > { %v936_v19 = vpop.permute.xlu1 %935 }
 0x15e   : > { %v920_v35 = vpop.permute.xlu0 %919  ;;  %v1222_v43 = vsel %vm1192_vm5, %v1189_v8, %v936_v19 }
 0x15f   : > { %v1206_v49 = vsel %vm1192_vm5, %v1173_v15, %v920_v35 }
 0x161   : > { %v938_v12 = vpop.permute.xlu1 %937 }
 0x162   : > { %v922_v18 = vpop.permute.xlu0 %921  ;;  %v1224_v5 = vsel %vm1192_vm5, %v1191_v24, %v938_v12 }
 0x163   : > { %v1208_v16 = vsel %vm1192_vm5, %v1175_v31, %v922_v18 }
 0x165   : > { %v971_v29 = vpop.permute.xlu1 %970 }
 0x166   : > { %v955_v40 = vpop.permute.xlu0 %954  ;;  %v1255_v56 = vsel %vm1225_vm7, %v1222_v43, %v971_v29 }
 0x167   : > { %v1239_v14 = vsel %vm1225_vm7, %v1206_v49, %v955_v40 }
 0x169   : > { %v973_v0 = vpop.permute.xlu1 %972 }
 0x16a   : > { %v957_v60 = vpop.permute.xlu0 %956  ;;  %v1257_v28 = vsel %vm1225_vm7, %v1224_v5, %v973_v0 }
 0x16b   : > { %v1241_v36 = vsel %vm1225_vm7, %v1208_v16, %v957_v60 }
 0x16d   : > { %v1008_v6 = vpop.permute.xlu1 %1007 }
 0x16e   : > { %v992_v23 = vpop.permute.xlu0 %991  ;;  %v1288_v58 = vsel %vm1258_vm8, %v1255_v56, %v1008_v6 }
 0x16f   : > { %v1272_v41 = vsel %vm1258_vm8, %v1239_v14, %v992_v23 }
 0x171   : > { %v1010_v53 = vpop.permute.xlu1 %1009 }
 0x172   : > { %v994_v34 = vpop.permute.xlu0 %993  ;;  %v1290_v54 = vsel %vm1258_vm8, %v1257_v28, %v1010_v53 }
 0x173   : > { %v1274_v55 = vsel %vm1258_vm8, %v1241_v36, %v994_v34 }
 0x175   : > { %v1055_v52 = vpop.permute.xlu1 %1054 }
 0x176   : > { %v1039_v7 = vpop.permute.xlu0 %1038  ;;  %v1321_v3 = vsel %vm1291_vm9, %v1288_v58, %v1055_v52 }
 0x177   : > { %v1305_v45 = vsel %vm1291_vm9, %v1272_v41, %v1039_v7 }
 0x179   : > { %v1057_v20 = vpop.permute.xlu1 %1056 }
 0x17a   : > { %v1041_v44 = vpop.permute.xlu0 %1040  ;;  %v1323_v17 = vsel %vm1291_vm9, %v1290_v54, %v1057_v20 }
 0x17b   : > { %v1307_v51 = vsel %vm1291_vm9, %v1274_v55, %v1041_v44 }
 0x17d   : > { %v1090_v61 = vpop.permute.xlu1 %1089 }
 0x17e   : > { %v1354_v63 = vsel %vm1324_vm10, %v1321_v3, %v1090_v61  ;;  %v1074_v9 = vpop.permute.xlu0 %1073 }
 0x17f   : > { %1896 = vmatprep.mubr.msk.bf16.mxu1 %vm1384_vm11, %v1354_v63  ;;  %v1338_v4 = vsel %vm1324_vm10, %v1305_v45, %v1074_v9 }
 0x180   : > { %1880 = vmatprep.mubr.msk.bf16.mxu0 %vm1384_vm11, %v1338_v4 }
 0x181   : > { %v1092_v13 = vpop.permute.xlu1 %1091 }
 0x182   : > { %v1356_v30 = vsel %vm1324_vm10, %v1323_v17, %v1092_v13  ;;  %v1076_v21 = vpop.permute.xlu0 %1075 }
 0x183   : > { %1897 = vmatmul.mubr.msk.bf16.gmra.mrb[12].mxu1 %vm1384_vm11, %v1356_v30  ;;  %v1340_v37 = vsel %vm1324_vm10, %v1307_v51, %v1076_v21 }
 0x184   : > { %1881 = vmatmul.mubr.msk.bf16.gmra.mrb[12].mxu0 %vm1384_vm11, %v1340_v37 }
 0x19a   : > { %v1886_v39 = vpop.f32.mrb[0].mxu1 }
 0x19b   : > { %v1528_v48 = vadd.f32 %v1886_v39, %v2748_v10  ;;  %v1519_v57 = vpop.f32.mrb[1].mxu1  ;;  %v1870_v25 = vpop.f32.mrb[0].mxu0 }
 0x19c   : > { %v1520_v1 = vadd.f32 %v2748_v10, %v1519_v57  ;;  %v1887_v32 = vpop.f32.mrb[2].mxu1  ;;  %v1464_v33 = vadd.f32 %v1870_v25, %v2748_v10  ;;  %v1455_v59 = vpop.f32.mrb[1].mxu0 }
 0x19d   : > { %1600 = vst.msk [vmem:[%s2753_s24 + $0x90] sm:$0xff] %vm1126_vm4, %v1528_v48  ;;  %v1531_v62 = vadd.f32 %v1887_v32, %v2748_v10  ;;  %v1522_v27 = vpop.f32.mrb[3].mxu1  ;;  %v1456_v46 = vadd.f32 %v2748_v10, %v1455_v59  ;;  %v1871_v19 = vpop.f32.mrb[2].mxu0 }
 0x19e   : > { %1598 = vst.msk [vmem:[%s2753_s24 + $0x80] sm:$0xff] %vm1126_vm4, %v1520_v1  ;;  %v1523_v35 = vadd.f32 %v2748_v10, %v1522_v27  ;;  %1584 = vst.msk [vmem:[%s2753_s24 + $0x10] sm:$0xff] %vm1126_vm4, %v1464_v33  ;;  %v1467_v12 = vadd.f32 %v1871_v19, %v2748_v10  ;;  %v1458_v18 = vpop.f32.mrb[3].mxu0 }
 0x19f   : > { %1601 = vst.msk [vmem:[%s2753_s24 + $0x98] sm:$0xff] %vm1126_vm4, %v1531_v62  ;;  %1582 = vst.msk [vmem:[%s2753_s24] sm:$0xff] %vm1126_vm4, %v1456_v46  ;;  %v1459_v29 = vadd.f32 %v2748_v10, %v1458_v18 }
 0x1a0   : > { %1599 = vst.msk [vmem:[%s2753_s24 + $0x88] sm:$0xff] %vm1126_vm4, %v1523_v35  ;;  %1585 = vst.msk [vmem:[%s2753_s24 + $0x18] sm:$0xff] %vm1126_vm4, %v1467_v12 }
 0x1a1   : > { %1583 = vst.msk [vmem:[%s2753_s24 + $0x8] sm:$0xff] %vm1126_vm4, %v1459_v29 }
 0x1da   : > { %v1890_v40 = vpop.f32.mrb[4].mxu1 }
 0x1db   : > { %v1544_v0 = vadd.f32 %v1890_v40, %v2748_v10  ;;  %v1535_v60 = vpop.f32.mrb[5].mxu1  ;;  %v1874_v6 = vpop.f32.mrb[4].mxu0 }
 0x1dc   : > { %v1536_v23 = vadd.f32 %v2748_v10, %v1535_v60  ;;  %v1891_v53 = vpop.f32.mrb[6].mxu1  ;;  %v1480_v34 = vadd.f32 %v1874_v6, %v2748_v10  ;;  %v1471_v52 = vpop.f32.mrb[5].mxu0 }
 0x1dd   : > { %1604 = vst.msk [vmem:[%s2753_s24 + $0xb0] sm:$0xff] %vm1126_vm4, %v1544_v0  ;;  %v1547_v50 = vadd.f32 %v1891_v53, %v2748_v10  ;;  %v1538_v7 = vpop.f32.mrb[7].mxu1  ;;  %v1472_v47 = vadd.f32 %v2748_v10, %v1471_v52  ;;  %v1875_v38 = vpop.f32.mrb[6].mxu0 }
 0x1de   : > { %1602 = vst.msk [vmem:[%s2753_s24 + $0xa0] sm:$0xff] %vm1126_vm4, %v1536_v23  ;;  %v1539_v8 = vadd.f32 %v2748_v10, %v1538_v7  ;;  %1588 = vst.msk [vmem:[%s2753_s24 + $0x30] sm:$0xff] %vm1126_vm4, %v1480_v34  ;;  %v1483_v20 = vadd.f32 %v1875_v38, %v2748_v10  ;;  %v1474_v42 = vpop.f32.mrb[7].mxu0 }
 0x1df   : > { %1605 = vst.msk [vmem:[%s2753_s24 + $0xb8] sm:$0xff] %vm1126_vm4, %v1547_v50  ;;  %1586 = vst.msk [vmem:[%s2753_s24 + $0x20] sm:$0xff] %vm1126_vm4, %v1472_v47  ;;  %v1475_v43 = vadd.f32 %v2748_v10, %v1474_v42 }
 0x1e0   : > { %1603 = vst.msk [vmem:[%s2753_s24 + $0xa8] sm:$0xff] %vm1126_vm4, %v1539_v8  ;;  %1589 = vst.msk [vmem:[%s2753_s24 + $0x38] sm:$0xff] %vm1126_vm4, %v1483_v20 }
 0x1e1   : > { %1587 = vst.msk [vmem:[%s2753_s24 + $0x28] sm:$0xff] %vm1126_vm4, %v1475_v43 }
 0x21a   : > { %v1894_v11 = vpop.f32.mrb[8].mxu1 }
 0x21b   : > { %v1560_v15 = vadd.f32 %v1894_v11, %v2748_v10  ;;  %v1551_v56 = vpop.f32.mrb[9].mxu1  ;;  %v1878_v44 = vpop.f32.mrb[8].mxu0 }
 0x21c   : > { %v1552_v22 = vadd.f32 %v2748_v10, %v1551_v56  ;;  %v1895_v49 = vpop.f32.mrb[10].mxu1  ;;  %v1496_v58 = vadd.f32 %v1878_v44, %v2748_v10  ;;  %v1487_v2 = vpop.f32.mrb[9].mxu0 }
 0x21d   : > { %1608 = vst.msk [vmem:[%s2753_s24 + $0xd0] sm:$0xff] %vm1126_vm4, %v1560_v15  ;;  %v1563_v24 = vadd.f32 %v1895_v49, %v2748_v10  ;;  %v1554_v14 = vpop.f32.mrb[11].mxu1  ;;  %v1488_v3 = vadd.f32 %v2748_v10, %v1487_v2  ;;  %v1879_v61 = vpop.f32.mrb[10].mxu0 }
 0x21e   : > { %1606 = vst.msk [vmem:[%s2753_s24 + $0xc0] sm:$0xff] %vm1126_vm4, %v1552_v22  ;;  %v1555_v26 = vadd.f32 %v2748_v10, %v1554_v14  ;;  %1592 = vst.msk [vmem:[%s2753_s24 + $0x50] sm:$0xff] %vm1126_vm4, %v1496_v58  ;;  %v1499_v5 = vadd.f32 %v1879_v61, %v2748_v10  ;;  %v1490_v41 = vpop.f32.mrb[11].mxu0 }
 0x21f   : > { %1609 = vst.msk [vmem:[%s2753_s24 + $0xd8] sm:$0xff] %vm1126_vm4, %v1563_v24  ;;  %1590 = vst.msk [vmem:[%s2753_s24 + $0x40] sm:$0xff] %vm1126_vm4, %v1488_v3  ;;  %v1491_v63 = vadd.f32 %v2748_v10, %v1490_v41 }
 0x220   : > { %1607 = vst.msk [vmem:[%s2753_s24 + $0xc8] sm:$0xff] %vm1126_vm4, %v1555_v26  ;;  %1593 = vst.msk [vmem:[%s2753_s24 + $0x58] sm:$0xff] %vm1126_vm4, %v1499_v5 }
 0x221   : > { %1591 = vst.msk [vmem:[%s2753_s24 + $0x48] sm:$0xff] %vm1126_vm4, %v1491_v63 }
 0x256   : > { %v1898_v31 = vpop.f32.mrb[12].mxu1 }
 0x257   : > { %v1576_v28 = vadd.f32 %v1898_v31, %v2748_v10  ;;  %v1567_v45 = vpop.f32.mrb[13].mxu1  ;;  %v1882_v9 = vpop.f32.mrb[12].mxu0 }
 0x258   : > { %v1568_v16 = vadd.f32 %v2748_v10, %v1567_v45  ;;  %v1899_v54 = vpop.f32.mrb[14].mxu1  ;;  %v1512_v4 = vadd.f32 %v1882_v9, %v2748_v10  ;;  %v1503_v36 = vpop.f32.mrb[13].mxu0 }
 0x259   : > { %1612 = vst.msk [vmem:[%s2753_s24 + $0xf0] sm:$0xff] %vm1126_vm4, %v1576_v28  ;;  %v1579_v17 = vadd.f32 %v1899_v54, %v2748_v10  ;;  %v1570_v13 = vpop.f32.mrb[15].mxu1  ;;  %v1504_v55 = vadd.f32 %v2748_v10, %v1503_v36  ;;  %v1883_v30 = vpop.f32.mrb[14].mxu0 }
 0x25a   : > { %1610 = vst.msk [vmem:[%s2753_s24 + $0xe0] sm:$0xff] %vm1126_vm4, %v1568_v16  ;;  %v1571_v51 = vadd.f32 %v2748_v10, %v1570_v13  ;;  %1596 = vst.msk [vmem:[%s2753_s24 + $0x70] sm:$0xff] %vm1126_vm4, %v1512_v4  ;;  %v1515_v21 = vadd.f32 %v1883_v30, %v2748_v10  ;;  %v1506_v37 = vpop.f32.mrb[15].mxu0 }
 0x25b   : > { %1613 = vst.msk [vmem:[%s2753_s24 + $0xf8] sm:$0xff] %vm1126_vm4, %v1579_v17  ;;  %1594 = vst.msk [vmem:[%s2753_s24 + $0x60] sm:$0xff] %vm1126_vm4, %v1504_v55  ;;  %v1507_v39 = vadd.f32 %v2748_v10, %v1506_v37 }
 0x25c   : > { %1611 = vst.msk [vmem:[%s2753_s24 + $0xe8] sm:$0xff] %vm1126_vm4, %v1571_v51  ;;  %1597 = vst.msk [vmem:[%s2753_s24 + $0x78] sm:$0xff] %vm1126_vm4, %v1515_v21 }
 0x25d   : > { %1595 = vst.msk [vmem:[%s2753_s24 + $0x68] sm:$0xff] %vm1126_vm4, %v1507_v39 }
 0x25e PF: > { %s14_s17 = sadd.s32 1, %s2006_s17   ;;  %s2865_s15 = smov %s2002_s16 }
 0x25f   : > { %p11_p5 = scmp.ge.s32.totalorder %s14_s17, 4   ;;  %s2866_s16 = smov %s2868_s18 }
 0x261   :  { %13 = sbr.rel (!%p11_p5) target bundleno = 2 (0x2), region = 75 }

</bundles_post_ra>
